<compile_context>
chip_gen: v7x
topology: tpu7x:2x2x1
jax: 0.10.0
libtpu: 0.0.40
codegen_flags: <defaults>
</compile_context>

<pallas_src>
import math

import jax
import jax.numpy as jnp
from jax.experimental import pallas as pl
from jax.experimental.pallas import tpu as pltpu


def _weight_schema_kernel(adj_ref, h_ref, w_ref, o_ref):
    """One grid step == one graph of the batch.

    adj_ref: (1, K, Np, Np) f32   stacked adjacencies of this graph
    h_ref:   (1, Np, Dp)    bf16  node features (zero-padded, lane-dense)
    w_ref:   (Dp, Dp)       bf16  shared weight (constant block, stays resident)
    o_ref:   (1, Np, Dp)    f32   lane-dense output tile
    """
    # K-reduction of the adjacency list in f32 on the VPU (v5e-safe; no bf16 VALU there).
    adj_sum = jnp.sum(adj_ref[0], axis=0)                              # (Np, Np) f32

    # hw = h @ W on the MXU: native bf16 inputs, f32 accumulation.
    hw = jnp.dot(h_ref[0], w_ref[...],
                 preferred_element_type=jnp.float32)                   # (Np, Dp) f32

    # out = adj_sum @ hw: cast operands to bf16 once, accumulate in f32.
    out = jnp.dot(adj_sum.astype(jnp.bfloat16), hw.astype(jnp.bfloat16),
                  preferred_element_type=jnp.float32)                  # (Np, Dp) f32

    # The PyTorch module discards tanh(out + bias), so nothing further is applied.
    o_ref[0] = out.astype(o_ref.dtype)


def weight_schema_forward(h, adj_stack, weight):
    """Batched Weight_Schema forward.

    h:         (B, N, D)    f32
    adj_stack: (B, K, N, N) f32
    weight:    (D, D)       f32
    returns:   (B, N, D)    f32  ==  (sum_k adj_stack[b, k]) @ (h[b] @ weight)
    """
    B, N, D = h.shape
    K = adj_stack.shape[1]

    LANE, SUBLANE = 128, 8
    Dp = max(LANE, -(-D // LANE) * LANE)         # lane-dense feature dim (multiple of 128)
    Np = max(SUBLANE, -(-N // SUBLANE) * SUBLANE)  # sublane-aligned node dim (multiple of 8)

    # Zero-padding is exact: padded rows/cols contribute nothing to the product.
    # h and W are cast to bf16 here so the DMA'd matmul operands are MXU-native;
    # adj stays f32 so the K-reduction runs in f32 inside the kernel.
    h_p = jnp.zeros((B, Np, Dp), jnp.bfloat16).at[:, :N, :D].set(
        h.astype(jnp.bfloat16))
    w_p = jnp.zeros((Dp, Dp), jnp.bfloat16).at[:D, :D].set(
        weight.astype(jnp.bfloat16))
    adj_p = jnp.zeros((B, K, Np, Np), jnp.float32).at[:, :, :N, :N].set(
        adj_stack.astype(jnp.float32))

    out_p = pl.pallas_call(
        _weight_schema_kernel,
        out_shape=jax.ShapeDtypeStruct((B, Np, Dp), jnp.float32),
        grid=(B,),
        in_specs=[
            pl.BlockSpec((1, K, Np, Np), lambda b: (b, 0, 0, 0)),
            pl.BlockSpec((1, Np, Dp), lambda b: (b, 0, 0)),
            pl.BlockSpec((Dp, Dp), lambda b: (0, 0)),   # constant block: not re-fetched
        ],
        out_specs=pl.BlockSpec((1, Np, Dp), lambda b: (b, 0, 0)),
        compiler_params=pltpu.CompilerParams(
            dimension_semantics=("parallel",)),   # graphs shard across v7x's 2 TensorCores
    )(adj_p, h_p, w_p)

    return out_p[:, :N, :D]


if __name__ == "__main__":
    # Small, forward-consistent shapes (now batched over graphs).
    hid_dim = 32      # feature dim of h and W
    n_nodes = 16      # nodes per graph
    n_adj = 3         # adjacency matrices in the Adj list
    batch = 8         # graphs amortized by one pallas_call

    key = jax.random.PRNGKey(0)
    k_h, k_adj, k_w, k_b = jax.random.split(key, 4)

    # Parameter init mirroring reset_parameters(): uniform(-stdv, stdv), stdv = 1/sqrt(hid_dim).
    stdv = 1.0 / math.sqrt(hid_dim)
    weight = jax.random.uniform(k_w, (hid_dim, hid_dim),
                                dtype=jnp.float32, minval=-stdv, maxval=stdv)
    bias = jax.random.uniform(k_b, (hid_dim,),
                              dtype=jnp.float32, minval=-stdv, maxval=stdv)
    # bias is a real parameter of the module but does not affect the returned output
    # (the tanh(output + bias) results are discarded upstream).

    h = jax.random.normal(k_h, (batch, n_nodes, hid_dim), dtype=jnp.float32)
    adj_stack = jax.random.uniform(k_adj, (batch, n_adj, n_nodes, n_nodes),
                                   dtype=jnp.float32)

    fwd = jax.jit(weight_schema_forward)
    out = fwd(h, adj_stack, weight)
    out = jax.block_until_ready(out)

    # Pure-JAX f32 reference: sum_k adj[b,k] @ (h[b] @ W).
    ref = jnp.einsum('bij,bjd->bid',
                     jnp.sum(adj_stack, axis=1),
                     jnp.einsum('bnd,de->bne', h, weight))

    assert out.shape == (batch, n_nodes, hid_dim)
    # bf16 MXU inputs with f32 accumulation -> compare with a bf16-appropriate tolerance.
    rel_err = jnp.sqrt(jnp.sum((out - ref) ** 2)) / jnp.sqrt(jnp.sum(ref ** 2))
    max_abs = jnp.max(jnp.abs(out - ref))
    assert rel_err < 3e-2, f"relative error too high: {rel_err} (max abs {max_abs})"

    print("KERNEL_OK")
</pallas_src>

<mosaic_0001>
module attributes {stable_mosaic.version = 11 : i64} {
  func.func @_weight_schema_kernel(%arg0: i32, %arg1: memref<1x3x16x16xf32, #tpu.memory_space<vmem>>, %arg2: memref<1x16x128xbf16, #tpu.memory_space<vmem>>, %arg3: memref<128x128xbf16, #tpu.memory_space<vmem>>, %arg4: memref<1x16x128xf32, #tpu.memory_space<vmem>>) attributes {dimension_semantics = [#tpu.dimension_semantics<parallel>], iteration_bounds = array<i64: 8>, scalar_prefetch = 0 : i64, scratch_operands = 0 : i64, tpu.core_type = #tpu.core_type<tc>, window_params = [{transform_indices = @transform_0, window_bounds = array<i64: 1, 3, 16, 16>}, {transform_indices = @transform_1, window_bounds = array<i64: 1, 16, 128>}, {pipeline_mode = #tpu.pipeline_mode<synchronous>, transform_indices = @transform_2, window_bounds = array<i64: 128, 128>}, {transform_indices = @transform_3, window_bounds = array<i64: 1, 16, 128>}]} {
    %c0 = arith.constant 0 : index
    %c0_0 = arith.constant 0 : index
    %c0_1 = arith.constant 0 : index
    %c0_2 = arith.constant 0 : index
    %0 = vector.load %arg1[%c0, %c0_0, %c0_1, %c0_2] : memref<1x3x16x16xf32, #tpu.memory_space<vmem>>, vector<1x3x16x16xf32>
    %1 = vector.shape_cast %0 : vector<1x3x16x16xf32> to vector<3x16x16xf32>
    %cst = arith.constant dense<0.000000e+00> : vector<16x16xf32>
    %2 = vector.multi_reduction <add>, %1, %cst [0] : vector<3x16x16xf32> to vector<16x16xf32>
    %c0_3 = arith.constant 0 : index
    %c0_4 = arith.constant 0 : index
    %c0_5 = arith.constant 0 : index
    %3 = vector.load %arg2[%c0_3, %c0_4, %c0_5] : memref<1x16x128xbf16, #tpu.memory_space<vmem>>, vector<1x16x128xbf16>
    %4 = vector.shape_cast %3 : vector<1x16x128xbf16> to vector<16x128xbf16>
    %c0_6 = arith.constant 0 : index
    %c0_7 = arith.constant 0 : index
    %5 = vector.load %arg3[%c0_6, %c0_7] : memref<128x128xbf16, #tpu.memory_space<vmem>>, vector<128x128xbf16>
    %cst_8 = arith.constant dense<0.000000e+00> : vector<16x128xf32>
    %6 = tpu.matmul %4, %5, %cst_8 {dimension_numbers = #tpu.dot_dimension_numbers<[1], [0], [0], [1], [0, 0, 1, 1], [], []>} : vector<16x128xbf16>, vector<128x128xbf16>, vector<16x128xf32> -> vector<16x128xf32>
    %7 = arith.truncf %2 : vector<16x16xf32> to vector<16x16xbf16>
    %8 = arith.truncf %6 : vector<16x128xf32> to vector<16x128xbf16>
    %cst_9 = arith.constant dense<0.000000e+00> : vector<16x128xf32>
    %9 = tpu.matmul %7, %8, %cst_9 {dimension_numbers = #tpu.dot_dimension_numbers<[1], [0], [0], [1], [0, 0, 1, 1], [], []>} : vector<16x16xbf16>, vector<16x128xbf16>, vector<16x128xf32> -> vector<16x128xf32>
    %c0_10 = arith.constant 0 : index
    %c0_11 = arith.constant 0 : index
    %c0_12 = arith.constant 0 : index
    %10 = vector.load %arg4[%c0_10, %c0_11, %c0_12] : memref<1x16x128xf32, #tpu.memory_space<vmem>>, vector<1x16x128xf32>
    %11 = vector.shape_cast %10 : vector<1x16x128xf32> to vector<16x128xf32>
    %12 = vector.shape_cast %9 : vector<16x128xf32> to vector<1x16x128xf32>
    tpu.vector_store %arg4[%c0_10, %c0_11, %c0_12], %12 {strides = array<i32>} : memref<1x16x128xf32, #tpu.memory_space<vmem>>, vector<1x16x128xf32>,
    return
  }
  func.func @transform_0(%arg0: i32) -> (i32, i32, i32, i32) {
    %c0_i32 = arith.constant 0 : i32
    %c0_i32_0 = arith.constant 0 : i32
    %c0_i32_1 = arith.constant 0 : i32
    %c0_i32_2 = arith.constant 0 : i32
    return %arg0, %c0_i32, %c0_i32_0, %c0_i32_1 : i32, i32, i32, i32
  }
  func.func @transform_1(%arg0: i32) -> (i32, i32, i32) {
    %c0_i32 = arith.constant 0 : i32
    %c0_i32_0 = arith.constant 0 : i32
    %c0_i32_1 = arith.constant 0 : i32
    return %arg0, %c0_i32, %c0_i32_0 : i32, i32, i32
  }
  func.func @transform_2(%arg0: i32) -> (i32, i32) {
    %c0_i32 = arith.constant 0 : i32
    %c0_i32_0 = arith.constant 0 : i32
    %c0_i32_1 = arith.constant 0 : i32
    return %c0_i32, %c0_i32_0 : i32, i32
  }
  func.func @transform_3(%arg0: i32) -> (i32, i32, i32) {
    %c0_i32 = arith.constant 0 : i32
    %c0_i32_0 = arith.constant 0 : i32
    %c0_i32_1 = arith.constant 0 : i32
    return %arg0, %c0_i32, %c0_i32_0 : i32, i32, i32
  }
}

</mosaic_0001>

<bundles_post_ra>
// kernel: weight_schema_forward.1
= control target key start
LH: loop header
LB: loop body
LE: loop exit
PB: predicated region body
PF: predicated region fallthrough
CT: control target
= control target key end

     0   :  { %8 = vsyncpa [#allocation3], 0  ;;  %s797_s0 = inlined_call_operand.vmem [shape: f32[8,3,16,16], index: 0, kind: input, shape index: {}]   ;;  %s798_s1 = inlined_call_operand.vmem [shape: bf16[8,16,128], index: 1, kind: input, shape index: {}]   ;;  %s799_s2 = inlined_call_operand.vmem [shape: bf16[128,128], index: 2, kind: input, shape index: {}]   ;;  %s800_s3 = inlined_call_operand.hbm [shape: f32[8,16,128], index: 3, kind: output, shape index: {}]  }
   0x1   :  { %10 = vsyncpa [#allocation3 + $0x1], 0  ;;  %s660_s12 = smov 0   ;;  %s662_s13 = smov 0  }
   0x2   :  { %s664_s14 = smov 0   ;;  %s666_s15 = smov 0  }
   0x3 LB: > { %s681_s16 = sadd.s32 4294967295, %s633_s15   ;;  %s456_s17 = sadd.s32 4294967294, %s633_s15   ;;  %s633_s15 = sphi %s666_s15, %s806_s15   ;;  %s629_s14 = sphi %s664_s14, %s805_s14   ;;  %s625_s13 = sphi %s662_s13, %s804_s13   ;;  %s621_s12 = sphi %s660_s12, %s803_s12  }
   0x4   : > { %s685_s18 = sadd.s32 1, %s633_s15   ;;  %s96_s19 = sadd.s32 1, %s629_s14 }
   0x5   : > { %s93_s20 = ssub.s32 %s633_s15, %s685_s18  ;;  %p106_p0 = scmp.ne.s32.totalorder %s629_s14, %s625_s13 }
   0x6   : > { %p94_p1 = scmp.eq.s32.totalorder %s93_s20, 0  ;;  %p107_p2 = scmp.eq.s32.totalorder %s681_s16, 7 }
   0x7   : > { %p112_p3 = scmp.ne.s32.totalorder %s625_s13, %s621_s12  ;;  %p113_p4 = scmp.eq.s32.totalorder %s456_s17, 7 }
   0x8   : > { %s696_s21 = scalar_select %p94_p1, %s629_s14, %s96_s19  }
   0x9   : > { %p698_p5 = por %p107_p2, %p106_p0  ;;  %p702_p6 = por %p113_p4, %p112_p3 }
   0xa   : > { %p459_p7 = scmp.ge.s32.totalorder %s633_s15, 1  ;;  %p150_p8 = scmp.lt.s32.totalorder %s633_s15, 9 }
   0xc   : > { %p151_p9 = pnand %p459_p7, %p150_p8 }
   0xd   : > { %v562_v0 = vld [vmem:[%s799_s2] sm:$0xff] (!%p151_p9)   ;;  %v635_v1 = vmov (!%p151_p9), 0.0   ;;  %v563_v2 = vld [vmem:[%s799_s2 + $0x8] sm:$0xff] (!%p151_p9)   ;;  %vm636_vm0 = vmmov (!%p151_p9), 0   ;;  %p179_p10 = scmp.lt.s32.totalorder (!%p151_p9), %s681_s16, 7  ;;  %v564_v3 = vld [vmem:[%s799_s2 + $0x10] sm:$0xff] (!%p151_p9)  }
   0xe   : > { %154 = sbr.rel (%p151_p9) target bundleno = 494 (0x1ee), region = 32  ;;  %492 = vmatprep.subr.bf16.mxu0 (!%p151_p9), %v635_v1  ;;  %512 = vmatprep.subr.bf16.mxu1 (!%p151_p9), %v635_v1  ;;  %v565_v4 = vld [vmem:[%s799_s2 + $0x18] sm:$0xff] (!%p151_p9)   ;;  %v566_v5 = vld [vmem:[%s799_s2 + $0x20] sm:$0xff] (!%p151_p9)   ;;  %v567_v6 = vld [vmem:[%s799_s2 + $0x28] sm:$0xff] (!%p151_p9)   ;;  %vm196_vm1 = vcmask (!%p151_p9), 130048   ;;  %s480_s8 = sshll.u32 (!%p151_p9), %s681_s16, 8 }
   0xf   : > { %493 = vmatpush3.bf16.msra.mxu0 (!%p151_p9), %v562_v0  ;;  %508 = vmatprep.mubr.msk.bf16.mxu0 (!%p151_p9), %vm636_vm0, %v635_v1  ;;  %v568_v7 = vld [vmem:[%s799_s2 + $0x30] sm:$0xff] (!%p151_p9)   ;;  %v569_v8 = vld [vmem:[%s799_s2 + $0x38] sm:$0xff] (!%p151_p9)   ;;  %s754_s11 = scalar_lea.hbm (!%p151_p9), %s800_s3, %s480_s8 }
  0x10   : > { %494 = vmatprep.subr.bf16.mxu0 (!%p151_p9), %v635_v1  ;;  %514 = vmatprep.mubr.msk.bf16.mxu1 (!%p151_p9), %vm636_vm0, %v635_v1 }
  0x13   : > { %495 = vmatpush3.bf16.msra.mxu0 (!%p151_p9), %v563_v2 }
  0x14   : > { %496 = vmatprep.subr.bf16.mxu0 (!%p151_p9), %v635_v1 }
  0x15   : > { %s180_s28 = scalar_select %p179_p10, %s681_s16, 7 }
  0x16   : > { %s637_s16 = smov [#allocation2]  }
  0x17   : > { %s479_s4 = sshll.u32 %s180_s28, 3  ;;  %497 = vmatpush3.bf16.msra.mxu0 %v564_v3  ;;  %s518_s27 = smul.u32 48, %s180_s28 }
  0x18   : > { %s188_s7 = scalar_lea.vmem %s798_s1, %s479_s4  ;;  %498 = vmatprep.subr.bf16.mxu0 %v635_v1  ;;  %s176_s28 = sand.u32 1, %s625_s13  }
  0x19   : > { %v570_v9 = vld [vmem:[%s188_s7] sm:$0xff]   ;;  %s183_s4 = scalar_lea.vmem %s797_s0, %s518_s27  ;;  %s460_s5 = sshll.u32 %s176_s28, 4 }
  0x1a   : > { %v190_v10 = vld [vmem:[%s183_s4] sm:$0xff]  ;;  %v191_v11 = vld [vmem:[%s183_s4 + $0x8] sm:$0xff]  ;;  %v192_v12 = vld [vmem:[%s183_s4 + $0x10] sm:$0xff]  ;;  %s178_s6 = scalar_lea.vmem [#allocation2], %s460_s5  ;;  %s756_s17 = scalar_lea.sflag [#allocation3], %s176_s28 }
  0x1b   : > { %499 = vmatpush3.bf16.msra.mxu0 %v565_v4  ;;  %v193_v13 = vld [vmem:[%s183_s4 + $0x18] sm:$0xff]  ;;  %v197_v14 = vsel %vm196_vm1, %v190_v10, 0.0  ;;  %v198_v15 = vsel %vm196_vm1, %v192_v12, 0.0  ;;  %v202_v16 = vsel %vm196_vm1, %v191_v11, 0.0  ;;  %v194_v18 = vld [vmem:[%s183_s4 + $0x20] sm:$0xff]  ;;  %v195_v19 = vld [vmem:[%s183_s4 + $0x28] sm:$0xff] }
  0x1c   : > { %500 = vmatprep.subr.bf16.mxu0 %v635_v1  ;;  %v203_v17 = vsel %vm196_vm1, %v193_v13, 0.0  ;;  %v199_v20 = vadd.f32 %v198_v15, %v197_v14  ;;  %v200_v22 = vsel %vm196_vm1, %v194_v18, 0.0  ;;  %v205_v23 = vsel %vm196_vm1, %v195_v19, 0.0  ;;  %s382_s7 = sshll.u32 %s178_s6, 4  ;;  %s575_s20 = sshll.u32 %s637_s16, 4  ;;  %s749_s7 = int_to_ptr.vmem [resolvable:$true] %s382_s7  ;;  %s576_s20 = int_to_ptr.vmem [resolvable:$false] %s575_s20 }
  0x1d   : > { %v204_v21 = vadd.f32 %v203_v17, %v202_v16  ;;  %s571_s19 = scalar_lea.vmem %s749_s7, 256  ;;  %s577_s24 = scalar_lea.vmem %s576_s20, 512 }
  0x1e   : > { %v201_v25 = vadd.f32 %v200_v22, %v199_v20  ;;  %p572_p11 = scmp.ne.s32.totalorder %s749_s7, %s571_s19  ;;  %p578_p0 = scmp.lt.s32.totalorder %s749_s7, %s576_s20 }
  0x1f   : > { %501 = vmatpush3.bf16.msra.mxu0 %v566_v5  ;;  %v206_v26 = vadd.f32 %v205_v23, %v204_v21  ;;  %p579_p1 = scmp.lt.s32.totalorder %s577_s24, %s571_s19 }
  0x20   : > { %502 = vmatprep.subr.bf16.mxu0 %v635_v1  ;;  %p573_p12 = pnand %p572_p11, %p698_p5 }
  0x21   : > { %v320_v31 = vpack.c.bf16 %v206_v26, %v201_v25  ;;  %p580_p2 = por %p579_p1, %p578_p0 }
  0x22   : > { %p574_p13 = pneg %p573_p12 }
  0x23   : > { %503 = vmatpush3.bf16.msra.mxu0 %v567_v6 }
  0x24   : > { %504 = vmatprep.subr.bf16.mxu0 %v635_v1  ;;  %p581_p3 = pnand %p580_p2, %p574_p13 }
  0x27   : > { %505 = vmatpush3.bf16.msra.mxu0 %v568_v7 }
  0x28   : > { %506 = vmatprep.subr.bf16.mxu0 %v635_v1 }
  0x2b   : > { %507 = vmatpush3.bf16.msra.mxu0 %v569_v8 }
  0x2e   : > { %509 = vmatmul.mubr.bf16.vlgmr.msra.gmra.mrb[0].mxu0 %v570_v9 }
 0x101   : > { %v313_v24 = vpop.f32.mrb[0].mxu0 }
 0x102   : > { %v510_v27 = vpop.f32.mrb[1].mxu0 }
 0x103   : > { %v316_v28 = vpop.f32.mrb[2].mxu0 }
 0x104   : > { %v321_v29 = vpack.c.bf16 %v316_v28, %v313_v24  ;;  %v511_v30 = vpop.f32.mrb[3].mxu0 }
 0x106   : > { %513 = vmatpush3.bf16.msra.mxu1 %v321_v29 }
 0x109   : > { %515 = vmatmul.mubr.msk.bf16.vlgmr.msra.gmra.mrb[0].mxu1 %vm196_vm1, %v320_v31 }
 0x1dc   : > { %v359_v32 = vpop.f32.mrb[0].mxu1 }
 0x1dd   : > { %366 = vst [vmem:[%s178_s6] sm:$0xff] %v359_v32  ;;  %v516_v33 = vpop.f32.mrb[1].mxu1 }
 0x1de   : > { %v362_v34 = vpop.f32.mrb[2].mxu1 }
 0x1df   : > { %367 = vst [vmem:[%s178_s6 + $0x8] sm:$0xff] %v362_v34  ;;  %v517_v35 = vpop.f32.mrb[3].mxu1 }
 0x1e0   : > { %584 = shalt.err (!%p581_p3)
}
 0x1e1   : > { %s585_s25 = scalar_lea.hbm %s754_s11, 256  ;;  %s589_s29 = scalar_lea.hbm %s800_s3, 2048 }
 0x1e2   : > { %p586_p4 = scmp.ne.s32.totalorder %s754_s11, %s585_s25  ;;  %p590_p9 = scmp.lt.u32.totalorder %s754_s11, %s800_s3 }
 0x1e3   : > { %p591_p10 = scmp.lt.u32.totalorder %s589_s29, %s585_s25  ;;  %p593_p12 = scmp.lt.u32.totalorder %s585_s25, %s754_s11 }
 0x1e4   : > { %p587_p7 = pnand %p586_p4, %p698_p5 }
 0x1e5   : > { %p592_p11 = por %p591_p10, %p590_p9 }
 0x1e6   : > { %p588_p8 = pneg %p587_p7 }
 0x1e7   : > { %p594_p13 = por %p593_p12, %p592_p11 }
 0x1e9   : > { %p595_p0 = pnand %p594_p13, %p588_p8 }
 0x1eb   : > { %598 = shalt.err (!%p595_p0)
}
 0x1ec   : > { %s638_s28 = smov 128   ;;  %s639_s5 = smov 8  }
 0x1ed   : > { %519 = dma.vmem_to_hbm [thread:$0]  (%p698_p5), %s749_s7, 256, %s754_s11, %s756_s17, %s638_s28, %s638_s28, %s639_s5  }
 0x1ee PF: > { %p525_p1 = scmp.ge.s32.totalorder %s633_s15, 2  ;;  %s397_s6 = sand.u32 1, %s621_s12  }
 0x1ef   : > { %s398_s8 = scalar_lea.sflag [#allocation3], %s397_s6 }
 0x1f0   : > { %p522_p2 = pnand %p525_p1, %p702_p6 }
 0x1f2   : > { %616 = dma.done.wait (!%p522_p2), %s398_s8, 256  }
 0x1f3   : > { %618 = vsyncadd (!%p522_p2), %s398_s8, 4294967040  ;;  %p13_p3 = scmp.ge.s32.totalorder %s685_s18, 10   ;;  %s803_s12 = smov %s625_s13 }
 0x1f4   : > { %s804_s13 = smov %s629_s14  ;;  %s805_s14 = smov %s696_s21 }
 0x1f5   : > { %s806_s15 = smov %s685_s18  ;;  %15 = sbr.rel (!%p13_p3) target bundleno = 3 (0x3), region = 70 }
 0x1fc   :  { %403 = vsyncpa [#allocation3], 1 }
 0x1fd   :  { %405 = vsyncpa [#allocation3 + $0x1], 1 }

</bundles_post_ra>
